<compile_context>
chip_gen: v6e
topology: v6e:2x2x1
jax: 0.10.0
libtpu: 0.0.40
codegen_flags: <defaults>
</compile_context>

<pallas_src>
import jax
import jax.numpy as jnp
from jax.experimental import pallas as pl
from jax.experimental.pallas import tpu as pltpu

_LANES = 128
_WIDE_LANES = 1024                           # 8 vregs wide per row when possible
_SMALL_WHOLE_BLOCK_BYTES = 4 * 1024 * 1024   # ragged arrays up to this: one VMEM block


def _identity_copy_kernel(x_ref, o_ref):
    # Straight VMEM tile copy.
    o_ref[...] = x_ref[...]


def _identity_dma_kernel(x_hbm_ref, o_hbm_ref, copy_sem):
    # Whole-array HBM->HBM DMA: one read, one write, no VMEM bounce.
    cp = pltpu.make_async_copy(x_hbm_ref, o_hbm_ref, copy_sem)
    cp.start()
    cp.wait()


def _min_sublanes(dtype) -> int:
    """Packed sublane granule per dtype: (8,128) f32, (16,128) bf16, (32,128) i8."""
    dt = jnp.dtype(dtype)
    if dt.name in ("int4", "uint4", "float4_e2m1fn"):
        # TODO(synk): confirm sub-byte packing granule before relying on this path.
        return 64
    return max(8, 32 // max(int(dt.itemsize), 1))


def _chip_config():
    """Returns (tile_bytes, vmem_limit_bytes, use_core_parallel) per TPU generation."""
    try:
        kind = jax.devices()[0].device_kind.lower()
    except Exception:  # pragma: no cover
        kind = ""
    if "v7" in kind or "7x" in kind:
        # v7x: 64 MiB physical VMEM. 2 bufs x (in+out) x 4 MiB = 16 MiB << 32 MiB.
        return 4 * 1024 * 1024, 32 * 1024 * 1024, True
    if "v6" in kind or "v5" in kind or "v4" in kind:
        # 128 MiB physical VMEM: 8 MiB tiles (4 x 8 = 32 MiB), raise scoped limit.
        return 8 * 1024 * 1024, 64 * 1024 * 1024, False
    # Unknown chip: conservative tiles, default scoped VMEM limit.
    return 2 * 1024 * 1024, None, False


def _tiled_copy(x2d, block_rows, semantics, vmem_limit):
    rows, lane = x2d.shape
    grid = (pl.cdiv(rows, block_rows),)
    return pl.pallas_call(
        _identity_copy_kernel,
        out_shape=jax.ShapeDtypeStruct((rows, lane), x2d.dtype),
        grid_spec=pltpu.PrefetchScalarGridSpec(
            num_scalar_prefetch=0,
            grid=grid,
            in_specs=[pl.BlockSpec((block_rows, lane), lambda i: (i, 0))],
            out_specs=pl.BlockSpec((block_rows, lane), lambda i: (i, 0)),
        ),
        compiler_params=pltpu.CompilerParams(
            dimension_semantics=semantics,
            vmem_limit_bytes=vmem_limit,
        ),
    )(x2d)


def _whole_block_copy(x):
    # No grid / no specs: full-extent blocks in VMEM (block == array dims, so the
    # (8,128) divisibility rule does not apply). For small arrays only.
    return pl.pallas_call(
        _identity_copy_kernel,
        out_shape=jax.ShapeDtypeStruct(x.shape, x.dtype),
    )(x)


def _hbm_dma_copy(x):
    # Large ragged sizes: single HBM->HBM DMA of the whole array.
    return pl.pallas_call(
        _identity_dma_kernel,
        out_shape=jax.ShapeDtypeStruct(x.shape, x.dtype),
        in_specs=[pl.BlockSpec(memory_space=pl.ANY)],
        out_specs=pl.BlockSpec(memory_space=pl.ANY),
        scratch_shapes=[pltpu.SemaphoreType.DMA(())],
    )(x)


def identity(x: jnp.ndarray, *, materialize: bool = True) -> jnp.ndarray:
    """Pallas identity: y = x (exact shape/dtype preservation).

    materialize=False: true no-op (returns x) -- use when the caller donates /
    passes the buffer through; zero HBM traffic.
    materialize=True (default): produce a fresh buffer via the copy kernel.
    """
    if not materialize:
        return x

    n = x.size
    if n == 0:
        return x

    orig_shape = x.shape
    dtype = x.dtype
    itemsize = int(jnp.dtype(dtype).itemsize)

    if n % _LANES != 0:
        # Ragged total size: no lane-dense reshape possible. No jnp.pad / tail
        # slice (those cost 2-3 extra full HBM passes); copy in original shape.
        if n * itemsize <= _SMALL_WHOLE_BLOCK_BYTES:
            return _whole_block_copy(x)
        return _hbm_dma_copy(x)

    tile_bytes, vmem_limit, use_core_parallel = _chip_config()
    sub = _min_sublanes(dtype)

    lane = _WIDE_LANES if n % _WIDE_LANES == 0 else _LANES
    rows = n // lane
    x2d = x.reshape(rows, lane)  # contiguous reshape only -- no padding

    # Biggest lane-dense tile that fits the per-generation budget, rounded to
    # the dtype's sublane granule; if the whole array is smaller, use one
    # full-extent block (block dim == array dim is always legal).
    target_rows = max(sub, (tile_bytes // (lane * itemsize)) // sub * sub)
    block_rows = rows if rows <= target_rows else target_rows
    grid_len = pl.cdiv(rows, block_rows)

    if use_core_parallel and grid_len >= 2:
        # v7x: genuinely split the DMA streams across both TensorCores.
        semantics = (pltpu.CORE_PARALLEL,)
    else:
        semantics = ("parallel",)

    try:
        y2d = _tiled_copy(x2d, block_rows, semantics, vmem_limit)
    except Exception:
        if semantics == ("parallel",):
            raise
        # Conservative fallback if CORE_PARALLEL is rejected on this chip.
        y2d = _tiled_copy(x2d, block_rows, ("parallel",), vmem_limit)

    return y2d.reshape(orig_shape)


if __name__ == "__main__":
    key = jax.random.PRNGKey(0)
    k0, k1 = jax.random.split(key)

    # Main (lane-aligned) path, shapes consistent with the module's usage.
    x = jax.random.normal(k0, (2, 4, 16, 16), dtype=jnp.float32)
    y = identity(x)
    jax.block_until_ready(y)
    assert y.shape == x.shape and y.dtype == x.dtype
    assert bool(jnp.all(y == x))

    # Ragged-size path (size not a multiple of 128): single full-extent block.
    xr = jax.random.normal(k1, (6, 20), dtype=jnp.float32)
    yr = identity(xr)
    jax.block_until_ready(yr)
    assert yr.shape == xr.shape and yr.dtype == xr.dtype
    assert bool(jnp.all(yr == xr))

    # Donated / pass-through fast path: true no-op.
    assert identity(x, materialize=False) is x

    print("KERNEL_OK")
</pallas_src>

<mosaic_0001>
module attributes {stable_mosaic.version = 11 : i64} {
  func.func @_identity_copy_kernel(%arg0: i32, %arg1: memref<2x1024xf32, #tpu.memory_space<vmem>>, %arg2: memref<2x1024xf32, #tpu.memory_space<vmem>>) attributes {dimension_semantics = [#tpu.dimension_semantics<parallel>], iteration_bounds = array<i64: 1>, scalar_prefetch = 0 : i64, scratch_operands = 0 : i64, tpu.core_type = #tpu.core_type<tc>, window_params = [{transform_indices = @transform_0, window_bounds = array<i64: 2, 1024>}, {transform_indices = @transform_1, window_bounds = array<i64: 2, 1024>}]} {
    %c0 = arith.constant 0 : index
    %c0_0 = arith.constant 0 : index
    %0 = vector.load %arg1[%c0, %c0_0] : memref<2x1024xf32, #tpu.memory_space<vmem>>, vector<2x1024xf32>
    %c0_1 = arith.constant 0 : index
    %c0_2 = arith.constant 0 : index
    %1 = vector.load %arg2[%c0_1, %c0_2] : memref<2x1024xf32, #tpu.memory_space<vmem>>, vector<2x1024xf32>
    tpu.vector_store %arg2[%c0_1, %c0_2], %0 {strides = array<i32>} : memref<2x1024xf32, #tpu.memory_space<vmem>>, vector<2x1024xf32>,
    return
  }
  func.func @transform_0(%arg0: i32) -> (i32, i32) {
    %c0_i32 = arith.constant 0 : i32
    %c0_i32_0 = arith.constant 0 : i32
    return %arg0, %c0_i32 : i32, i32
  }
  func.func @transform_1(%arg0: i32) -> (i32, i32) {
    %c0_i32 = arith.constant 0 : i32
    %c0_i32_0 = arith.constant 0 : i32
    return %arg0, %c0_i32 : i32, i32
  }
}

</mosaic_0001>

<bundles_post_ra>
// kernel: tpu_custom_call.1
= control target key start
LH: loop header
LB: loop body
LE: loop exit
PB: predicated region body
PF: predicated region fallthrough
CT: control target
= control target key end

     0   :  { %6 = vsyncpa [#allocation3], 0  ;;  %s104_s0 = inlined_call_operand.hbm [shape: f32[2,1024], index: 0, kind: input, shape index: {}]   ;;  %s105_s1 = inlined_call_operand.hbm [shape: f32[2,1024], index: 1, kind: output, shape index: {}]  }
   0x1   :  { %7 = vsyncpa [#allocation4], 0  ;;  %s86_s6 = smov [#allocation2]  }
   0x2   :  { %s14_s7 = sshll.u32 %s86_s6, 4  ;;  %s15_s7 = int_to_ptr.vmem [resolvable:$true] %s14_s7 }
   0x3   :  { %s50_s8 = scalar_lea.vmem %s15_s7, 256  ;;  %p55_p1 = scmp.lt.s32.totalorder %s15_s7, %s15_s7 }
   0x4   :  { %p51_p0 = scmp.ne.s32.totalorder %s15_s7, %s50_s8  ;;  %p56_p2 = scmp.lt.s32.totalorder %s50_s8, %s50_s8 }
   0x6   :  { %p57_p3 = por %p56_p2, %p55_p1 }
   0x8   :  { %p58_p4 = pnand %p57_p3, %p51_p0 }
   0xa   :  { %61 = shalt.err (!%p58_p4)
}
   0xb   :  { %17 = dma.hbm_to_vmem [thread:$0]  %s104_s0, 256, %s15_s7, [#allocation3]  }
   0xc   :  { %82 = dma.done.wait [#allocation3], 256  }
   0xd   :  { %83 = vsyncadd [#allocation3], 4294967040  ;;  %s87_s11 = smov [#allocation5]   ;;  %v21_v0 = vld [vmem:[#allocation2] sm:$0xff]  ;;  %v22_v1 = vld [vmem:[#allocation2 + $0x8] sm:$0xff] }
   0xe   :  { %s31_s12 = sshll.u32 %s87_s11, 4  ;;  %23 = vst [vmem:[#allocation5] sm:$0xff] %v21_v0  ;;  %24 = vst [vmem:[#allocation5 + $0x8] sm:$0xff] %v22_v1  ;;  %s32_s12 = int_to_ptr.vmem [resolvable:$true] %s31_s12 }
   0xf   :  { %s62_s13 = scalar_lea.vmem %s32_s12, 256  ;;  %p67_p6 = scmp.lt.s32.totalorder %s32_s12, %s32_s12 }
  0x10   :  { %p63_p5 = scmp.ne.s32.totalorder %s32_s12, %s62_s13  ;;  %p68_p7 = scmp.lt.s32.totalorder %s62_s13, %s62_s13 }
  0x12   :  { %p69_p8 = por %p68_p7, %p67_p6 }
  0x14   :  { %p70_p9 = pnand %p69_p8, %p63_p5 }
  0x16   :  { %73 = shalt.err (!%p70_p9)
}
  0x17   :  { %34 = dma.vmem_to_hbm [thread:$0]  %s32_s12, 256, %s105_s1, [#allocation4]  }
  0x18   :  { %84 = dma.done.wait [#allocation4], 256  }
  0x19   :  { %85 = vsyncadd [#allocation4], 4294967040 }
  0x1a   :  { %38 = vsyncpa [#allocation3], 1 }
  0x1b   :  { %39 = vsyncpa [#allocation4], 1 }

</bundles_post_ra>
